<compile_context>
chip_gen: v7x
topology: tpu7x:2x2x1
jax: 0.10.0
libtpu: 0.0.40
codegen_flags: <defaults>
</compile_context>

<pallas_src>
import functools

import jax
import jax.numpy as jnp
from jax.experimental import pallas as pl
from jax.experimental.pallas import tpu as pltpu


def _round_up(x, m):
    return (x + m - 1) // m * m


def _chip_vmem_bytes():
    try:
        return int(pltpu.get_tpu_info().vmem_capacity_bytes)
    except Exception:
        return 64 * 1024 * 1024  # conservative (v7x per-TC)


# ----------------------------------------------------------------------------- fused (primary)
def _make_fused_kernel(num_layers, compute_dtype):
    """grid = (batch_tiles,). refs = [x, w0, b0, ..., w_{L-1}, b_{L-1}, out]."""

    def kernel(*refs):
        x_ref = refs[0]
        o_ref = refs[1 + 2 * num_layers]
        h = x_ref[...]                                   # compute dtype, [tm, Kp0]
        for l in range(num_layers):                      # unrolled: LLO sees the whole stack
            w_ref = refs[1 + 2 * l]                      # [Kp_l, Np_l] (VMEM-resident)
            b_ref = refs[2 + 2 * l]                      # [1, Np_l] f32
            y = jnp.dot(h, w_ref[...], preferred_element_type=jnp.float32)
            y = y + b_ref[...]
            if l + 1 < num_layers:
                h = jnp.maximum(y, 0.0).astype(compute_dtype)
            else:
                o_ref[...] = y.astype(o_ref.dtype)

    return kernel


def _mlp_fused(x, params, compute_dtype, tm, bp, kps, nps, vmem_limit):
    batch, in_dim = x.shape
    num_layers = len(params)
    out_dtype = x.dtype

    x_p = jnp.zeros((bp, kps[0]), compute_dtype).at[:batch, :in_dim].set(
        x.astype(compute_dtype))

    flat_wb, in_specs = [], [pl.BlockSpec((tm, kps[0]), lambda i: (i, 0))]
    for (w, b), kp, np_ in zip(params, kps, nps):
        w_p = jnp.zeros((kp, np_), compute_dtype).at[:w.shape[0], :w.shape[1]].set(
            w.astype(compute_dtype))
        b_p = jnp.zeros((1, np_), jnp.float32).at[0, :b.shape[0]].set(b.astype(jnp.float32))
        flat_wb += [w_p, b_p]
        in_specs += [pl.BlockSpec((kp, np_), lambda i: (0, 0)),   # constant block -> fetched once
                     pl.BlockSpec((1, np_), lambda i: (0, 0))]

    out_p = pl.pallas_call(
        _make_fused_kernel(num_layers, compute_dtype),
        out_shape=jax.ShapeDtypeStruct((bp, nps[-1]), out_dtype),
        grid_spec=pltpu.PrefetchScalarGridSpec(
            num_scalar_prefetch=0,
            grid=(bp // tm,),
            in_specs=in_specs,
            out_specs=pl.BlockSpec((tm, nps[-1]), lambda i: (i, 0)),
        ),
        compiler_params=pltpu.CompilerParams(
            dimension_semantics=("parallel",),
            vmem_limit_bytes=vmem_limit,
        ),
    )(x_p, *flat_wb)

    return out_p[:batch, :params[-1][0].shape[1]]


# -------------------------------------------------------- layered fallback (stack > VMEM)
def _layered_kernel(x_ref, w_ref, b_ref, o_ref, h_ref):
    l = pl.program_id(1)
    last = pl.num_programs(1) - 1

    @pl.when(l == 0)
    def _():
        h_ref[...] = x_ref[...]

    y = jnp.dot(h_ref[...], w_ref[0], preferred_element_type=jnp.float32) + b_ref[0]

    @pl.when(l < last)
    def _():
        h_ref[...] = jnp.maximum(y, 0.0).astype(h_ref.dtype)

    @pl.when(l == last)
    def _():
        o_ref[...] = y.astype(o_ref.dtype)


def _mlp_layered(x, params, compute_dtype, tm, bp, kps, nps, vmem_limit):
    batch, in_dim = x.shape
    num_layers = len(params)
    out_dtype = x.dtype
    hp = max(max(kps), max(nps))   # single padded dim for the stacked weights

    x_p = jnp.zeros((bp, hp), compute_dtype).at[:batch, :in_dim].set(x.astype(compute_dtype))
    w_stack = jnp.stack([
        jnp.zeros((hp, hp), compute_dtype).at[:w.shape[0], :w.shape[1]].set(
            w.astype(compute_dtype)) for w, _ in params])
    b_stack = jnp.stack([
        jnp.zeros((1, hp), jnp.float32).at[0, :b.shape[0]].set(b.astype(jnp.float32))
        for _, b in params])

    out_p = pl.pallas_call(
        _layered_kernel,
        out_shape=jax.ShapeDtypeStruct((bp, hp), out_dtype),
        grid_spec=pltpu.PrefetchScalarGridSpec(
            num_scalar_prefetch=0,
            grid=(bp // tm, num_layers),
            in_specs=[
                pl.BlockSpec((tm, hp), lambda i, l: (i, 0)),        # x tile (resident over l)
                pl.BlockSpec((1, hp, hp), lambda i, l: (l, 0, 0)),  # layer-l weight (dbl-buf)
                pl.BlockSpec((1, 1, hp), lambda i, l: (l, 0, 0)),   # layer-l bias
            ],
            out_specs=pl.BlockSpec((tm, hp), lambda i, l: (i, 0)),  # written only at l==last
            scratch_shapes=[pltpu.VMEM((tm, hp), compute_dtype)],   # resident activation
        ),
        compiler_params=pltpu.CompilerParams(
            dimension_semantics=("parallel", "arbitrary"),
            vmem_limit_bytes=vmem_limit,
        ),
    )(x_p, w_stack, b_stack)

    return out_p[:batch, :params[-1][0].shape[1]]


# ------------------------------------------------------------------------------------ wrapper
def mlp_forward(x, params, *, compute_dtype=jnp.bfloat16, tm_max=256, force_layer_grid=False):
    """x: [B, input_dim]; params: list of (w [in, out], b [out]). ReLU on all but last layer."""
    batch, _ = x.shape
    w_item = jnp.dtype(compute_dtype).itemsize
    o_item = jnp.dtype(x.dtype).itemsize

    # Batch tiling: tm a multiple of 16 (bf16 sublane packing for the carried activation).
    tm_max = max(16, _round_up(tm_max, 16))
    bp = _round_up(batch, 16)
    tm = min(bp, tm_max)
    bp = _round_up(bp, tm)

    # Per-layer padded feature dims (lanes -> multiples of 128). Zero padding is exact:
    # padded lanes stay 0 through bias/ReLU, padded weight rows contribute 0.
    kps = [_round_up(w.shape[0], 128) for w, _ in params]
    nps = [_round_up(w.shape[1], 128) for w, _ in params]

    cap = _chip_vmem_bytes()
    budget = cap - 16 * 1024 * 1024

    # VMEM needed with the whole weight stack resident (x2 for pipeline buffering).
    w_bytes = sum(k * n for k, n in zip(kps, nps)) * w_item
    b_bytes = sum(nps) * 4
    io_bytes = 2 * tm * kps[0] * w_item + 2 * tm * nps[-1] * o_item
    fused_need = 2 * (w_bytes + b_bytes) + io_bytes

    if (not force_layer_grid) and fused_need <= budget:
        vmem_limit = int(min(max(2 * fused_need, 32 * 1024 * 1024), cap - 8 * 1024 * 1024))
        return _mlp_fused(x, params, compute_dtype, tm, bp, kps, nps, vmem_limit)

    # Fallback: per-layer weight DMA, layer axis on the grid.
    hp = max(max(kps), max(nps))
    layered_need = (2 * (hp * hp * w_item + hp * 4)
                    + 2 * tm * hp * (w_item + o_item) + tm * hp * w_item)
    vmem_limit = int(min(max(2 * layered_need, 32 * 1024 * 1024), cap - 8 * 1024 * 1024))
    # TODO(synk): if a single double-buffered [hp, hp] weight block still exceeds VMEM
    # (hp >~ 3.5k bf16 on v7x), add (tn, tk) weight tiling with a K-last accumulator axis.
    return _mlp_layered(x, params, compute_dtype, tm, bp, kps, nps, vmem_limit)


def init_mlp_params(key, input_dim, hidden_dim, output_dim, num_layers, dtype=jnp.float32):
    """Deterministic PyTorch-style uniform init: U(-1/sqrt(fan_in), 1/sqrt(fan_in))."""
    h = [hidden_dim] * (num_layers - 1)
    dims_in = [input_dim] + h
    dims_out = h + [output_dim]
    params = []
    for n_in, n_out in zip(dims_in, dims_out):
        key, kw, kb = jax.random.split(key, 3)
        bound = 1.0 / (n_in ** 0.5)
        w = jax.random.uniform(kw, (n_in, n_out), dtype, minval=-bound, maxval=bound)
        b = jax.random.uniform(kb, (n_out,), dtype, minval=-bound, maxval=bound)
        params.append((w, b))
    return params


def _ref_forward(x, params, compute_dtype):
    """Plain-JAX reference with the SAME operand-dtype / f32-accumulate math as the kernel."""
    h = x.astype(jnp.float32)
    for i, (w, b) in enumerate(params):
        h = jnp.dot(h.astype(compute_dtype), w.astype(compute_dtype),
                    preferred_element_type=jnp.float32) + b.astype(jnp.float32)
        if i < len(params) - 1:
            h = jnp.maximum(h, 0.0)
    return h


if __name__ == "__main__":
    key = jax.random.PRNGKey(0)

    # Config 1: module-implied small shapes, bf16 MXU path, fused kernel (resident weight stack).
    batch, input_dim, hidden_dim, output_dim, num_layers = 8, 32, 32, 16, 3
    kx, kp, k2 = jax.random.split(key, 3)
    x = jax.random.normal(kx, (batch, input_dim), jnp.float32)
    params = init_mlp_params(kp, input_dim, hidden_dim, output_dim, num_layers)

    out = jax.block_until_ready(jax.jit(mlp_forward)(x, params))
    ref = _ref_forward(x, params, jnp.bfloat16)
    assert out.shape == (batch, output_dim)
    assert jnp.allclose(out, ref, atol=1e-3, rtol=1e-3), float(jnp.max(jnp.abs(out - ref)))

    # Config 2: multiple batch tiles + f32 compute path (fused kernel).
    batch2, in2, hid2, out2, nl2 = 48, 20, 96, 10, 4
    kx2, kp2 = jax.random.split(k2)
    x2 = jax.random.normal(kx2, (batch2, in2), jnp.float32)
    params2 = init_mlp_params(kp2, in2, hid2, out2, nl2)
    fwd2 = jax.jit(functools.partial(mlp_forward, compute_dtype=jnp.float32, tm_max=16))
    out_2 = jax.block_until_ready(fwd2(x2, params2))
    ref_2 = _ref_forward(x2, params2, jnp.float32)
    assert out_2.shape == (batch2, out2)
    assert jnp.allclose(out_2, ref_2, atol=1e-3, rtol=1e-3), float(jnp.max(jnp.abs(out_2 - ref_2)))

    # Config 3: exercise the layer-grid fallback path (used when the stack exceeds VMEM).
    fwd3 = jax.jit(functools.partial(mlp_forward, force_layer_grid=True))
    out_3 = jax.block_until_ready(fwd3(x, params))
    assert out_3.shape == (batch, output_dim)
    assert jnp.allclose(out_3, ref, atol=1e-3, rtol=1e-3), float(jnp.max(jnp.abs(out_3 - ref)))

    print("KERNEL_OK")
</pallas_src>

<mosaic_0001>
module attributes {stable_mosaic.version = 11 : i64} {
  func.func @kernel(%arg0: i32, %arg1: memref<16x128xbf16, #tpu.memory_space<vmem>>, %arg2: memref<128x128xbf16, #tpu.memory_space<vmem>>, %arg3: memref<1x128xf32, #tpu.memory_space<vmem>>, %arg4: memref<128x128xbf16, #tpu.memory_space<vmem>>, %arg5: memref<1x128xf32, #tpu.memory_space<vmem>>, %arg6: memref<128x128xbf16, #tpu.memory_space<vmem>>, %arg7: memref<1x128xf32, #tpu.memory_space<vmem>>, %arg8: memref<16x128xf32, #tpu.memory_space<vmem>>) attributes {dimension_semantics = [#tpu.dimension_semantics<parallel>], iteration_bounds = array<i64: 1>, scalar_prefetch = 0 : i64, scratch_operands = 0 : i64, tpu.core_type = #tpu.core_type<tc>, window_params = [{transform_indices = @transform_0, window_bounds = array<i64: 16, 128>}, {pipeline_mode = #tpu.pipeline_mode<synchronous>, transform_indices = @transform_1, window_bounds = array<i64: 128, 128>}, {pipeline_mode = #tpu.pipeline_mode<synchronous>, transform_indices = @transform_2, window_bounds = array<i64: 1, 128>}, {pipeline_mode = #tpu.pipeline_mode<synchronous>, transform_indices = @transform_3, window_bounds = array<i64: 128, 128>}, {pipeline_mode = #tpu.pipeline_mode<synchronous>, transform_indices = @transform_4, window_bounds = array<i64: 1, 128>}, {pipeline_mode = #tpu.pipeline_mode<synchronous>, transform_indices = @transform_5, window_bounds = array<i64: 128, 128>}, {pipeline_mode = #tpu.pipeline_mode<synchronous>, transform_indices = @transform_6, window_bounds = array<i64: 1, 128>}, {transform_indices = @transform_7, window_bounds = array<i64: 16, 128>}]} {
    %c0 = arith.constant 0 : index
    %c0_0 = arith.constant 0 : index
    %0 = vector.load %arg1[%c0, %c0_0] : memref<16x128xbf16, #tpu.memory_space<vmem>>, vector<16x128xbf16>
    %c0_1 = arith.constant 0 : index
    %c0_2 = arith.constant 0 : index
    %1 = vector.load %arg2[%c0_1, %c0_2] : memref<128x128xbf16, #tpu.memory_space<vmem>>, vector<128x128xbf16>
    %cst = arith.constant dense<0.000000e+00> : vector<16x128xf32>
    %2 = tpu.matmul %0, %1, %cst {dimension_numbers = #tpu.dot_dimension_numbers<[1], [0], [0], [1], [0, 0, 1, 1], [], []>} : vector<16x128xbf16>, vector<128x128xbf16>, vector<16x128xf32> -> vector<16x128xf32>
    %c0_3 = arith.constant 0 : index
    %c0_4 = arith.constant 0 : index
    %3 = vector.load %arg3[%c0_3, %c0_4] : memref<1x128xf32, #tpu.memory_space<vmem>>, vector<1x128xf32>
    %4 = vector.broadcast %3 : vector<1x128xf32> to vector<16x128xf32>
    %5 = arith.addf %2, %4 : vector<16x128xf32>
    %cst_5 = arith.constant 0.000000e+00 : f32
    %6 = vector.broadcast %cst_5 : f32 to vector<16x128xf32>
    %7 = arith.maximumf %5, %6 : vector<16x128xf32>
    %8 = arith.truncf %7 : vector<16x128xf32> to vector<16x128xbf16>
    %c0_6 = arith.constant 0 : index
    %c0_7 = arith.constant 0 : index
    %9 = vector.load %arg4[%c0_6, %c0_7] : memref<128x128xbf16, #tpu.memory_space<vmem>>, vector<128x128xbf16>
    %cst_8 = arith.constant dense<0.000000e+00> : vector<16x128xf32>
    %10 = tpu.matmul %8, %9, %cst_8 {dimension_numbers = #tpu.dot_dimension_numbers<[1], [0], [0], [1], [0, 0, 1, 1], [], []>} : vector<16x128xbf16>, vector<128x128xbf16>, vector<16x128xf32> -> vector<16x128xf32>
    %c0_9 = arith.constant 0 : index
    %c0_10 = arith.constant 0 : index
    %11 = vector.load %arg5[%c0_9, %c0_10] : memref<1x128xf32, #tpu.memory_space<vmem>>, vector<1x128xf32>
    %12 = vector.broadcast %11 : vector<1x128xf32> to vector<16x128xf32>
    %13 = arith.addf %10, %12 : vector<16x128xf32>
    %cst_11 = arith.constant 0.000000e+00 : f32
    %14 = vector.broadcast %cst_11 : f32 to vector<16x128xf32>
    %15 = arith.maximumf %13, %14 : vector<16x128xf32>
    %16 = arith.truncf %15 : vector<16x128xf32> to vector<16x128xbf16>
    %c0_12 = arith.constant 0 : index
    %c0_13 = arith.constant 0 : index
    %17 = vector.load %arg6[%c0_12, %c0_13] : memref<128x128xbf16, #tpu.memory_space<vmem>>, vector<128x128xbf16>
    %cst_14 = arith.constant dense<0.000000e+00> : vector<16x128xf32>
    %18 = tpu.matmul %16, %17, %cst_14 {dimension_numbers = #tpu.dot_dimension_numbers<[1], [0], [0], [1], [0, 0, 1, 1], [], []>} : vector<16x128xbf16>, vector<128x128xbf16>, vector<16x128xf32> -> vector<16x128xf32>
    %c0_15 = arith.constant 0 : index
    %c0_16 = arith.constant 0 : index
    %19 = vector.load %arg7[%c0_15, %c0_16] : memref<1x128xf32, #tpu.memory_space<vmem>>, vector<1x128xf32>
    %20 = vector.broadcast %19 : vector<1x128xf32> to vector<16x128xf32>
    %21 = arith.addf %18, %20 : vector<16x128xf32>
    %c0_17 = arith.constant 0 : index
    %c0_18 = arith.constant 0 : index
    %22 = vector.load %arg8[%c0_17, %c0_18] : memref<16x128xf32, #tpu.memory_space<vmem>>, vector<16x128xf32>
    tpu.vector_store %arg8[%c0_17, %c0_18], %21 {strides = array<i32>} : memref<16x128xf32, #tpu.memory_space<vmem>>, vector<16x128xf32>,
    return
  }
  func.func @transform_0(%arg0: i32) -> (i32, i32) {
    %c0_i32 = arith.constant 0 : i32
    %c0_i32_0 = arith.constant 0 : i32
    return %arg0, %c0_i32 : i32, i32
  }
  func.func @transform_1(%arg0: i32) -> (i32, i32) {
    %c0_i32 = arith.constant 0 : i32
    %c0_i32_0 = arith.constant 0 : i32
    %c0_i32_1 = arith.constant 0 : i32
    return %c0_i32, %c0_i32_0 : i32, i32
  }
  func.func @transform_2(%arg0: i32) -> (i32, i32) {
    %c0_i32 = arith.constant 0 : i32
    %c0_i32_0 = arith.constant 0 : i32
    %c0_i32_1 = arith.constant 0 : i32
    return %c0_i32, %c0_i32_0 : i32, i32
  }
  func.func @transform_3(%arg0: i32) -> (i32, i32) {
    %c0_i32 = arith.constant 0 : i32
    %c0_i32_0 = arith.constant 0 : i32
    %c0_i32_1 = arith.constant 0 : i32
    return %c0_i32, %c0_i32_0 : i32, i32
  }
  func.func @transform_4(%arg0: i32) -> (i32, i32) {
    %c0_i32 = arith.constant 0 : i32
    %c0_i32_0 = arith.constant 0 : i32
    %c0_i32_1 = arith.constant 0 : i32
    return %c0_i32, %c0_i32_0 : i32, i32
  }
  func.func @transform_5(%arg0: i32) -> (i32, i32) {
    %c0_i32 = arith.constant 0 : i32
    %c0_i32_0 = arith.constant 0 : i32
    %c0_i32_1 = arith.constant 0 : i32
    return %c0_i32, %c0_i32_0 : i32, i32
  }
  func.func @transform_6(%arg0: i32) -> (i32, i32) {
    %c0_i32 = arith.constant 0 : i32
    %c0_i32_0 = arith.constant 0 : i32
    %c0_i32_1 = arith.constant 0 : i32
    return %c0_i32, %c0_i32_0 : i32, i32
  }
  func.func @transform_7(%arg0: i32) -> (i32, i32) {
    %c0_i32 = arith.constant 0 : i32
    %c0_i32_0 = arith.constant 0 : i32
    return %arg0, %c0_i32 : i32, i32
  }
}

</mosaic_0001>

<bundles_post_ra>
// kernel: mlp_forward.1
= control target key start
LH: loop header
LB: loop body
LE: loop exit
PB: predicated region body
PF: predicated region fallthrough
CT: control target
= control target key end

     0   :  { %v525_v0 = vmov 0.0   ;;  %vm526_vm0 = vmmov 0   ;;  %s687_s1 = inlined_call_operand.vmem [shape: bf16[128,128], index: 1, kind: input, shape index: {}]   ;;  %s688_s3 = inlined_call_operand.vmem [shape: bf16[128,128], index: 3, kind: input, shape index: {}]   ;;  %s689_s0 = inlined_call_operand.vmem [shape: bf16[16,128], index: 0, kind: input, shape index: {}]   ;;  %s690_s5 = inlined_call_operand.vmem [shape: bf16[128,128], index: 5, kind: input, shape index: {}]   ;;  %s691_s2 = inlined_call_operand.vmem [shape: f32[1,128], index: 2, kind: input, shape index: {}]   ;;  %s692_s4 = inlined_call_operand.vmem [shape: f32[1,128], index: 4, kind: input, shape index: {}]   ;;  %s693_s6 = inlined_call_operand.vmem [shape: f32[1,128], index: 6, kind: input, shape index: {}]   ;;  %s694_s7 = inlined_call_operand.vmem [shape: f32[16,128], index: 7, kind: output, shape index: {}]  }
   0x1   :  { %438 = vmatprep.subr.bf16.mxu0 %v525_v0  ;;  %v500_v1 = vld [vmem:[%s687_s1] sm:$0xff]   ;;  %454 = vmatprep.mubr.msk.bf16.mxu0 %vm526_vm0, %v525_v0  ;;  %v501_v2 = vld [vmem:[%s687_s1 + $0x8] sm:$0xff]   ;;  %v502_v3 = vld [vmem:[%s687_s1 + $0x10] sm:$0xff]  }
   0x2   :  { %458 = vmatprep.subr.bf16.mxu1 %v525_v0  ;;  %474 = vmatprep.mubr.msk.bf16.mxu1 %vm526_vm0, %v525_v0  ;;  %v509_v4 = vld [vmem:[%s688_s3] sm:$0xff]   ;;  %v503_v5 = vld [vmem:[%s687_s1 + $0x18] sm:$0xff]   ;;  %v510_v6 = vld [vmem:[%s688_s3 + $0x8] sm:$0xff]  }
   0x3   :  { %439 = vmatpush3.bf16.msra.mxu0 %v500_v1  ;;  %459 = vmatpush3.bf16.msra.mxu1 %v509_v4  ;;  %v504_v7 = vld [vmem:[%s687_s1 + $0x20] sm:$0xff]   ;;  %v511_v8 = vld [vmem:[%s688_s3 + $0x10] sm:$0xff]   ;;  %v505_v9 = vld [vmem:[%s687_s1 + $0x28] sm:$0xff]  }
   0x4   :  { %440 = vmatprep.subr.bf16.mxu0 %v525_v0  ;;  %460 = vmatprep.subr.bf16.mxu1 %v525_v0  ;;  %v512_v10 = vld [vmem:[%s688_s3 + $0x18] sm:$0xff]   ;;  %v506_v11 = vld [vmem:[%s687_s1 + $0x30] sm:$0xff]   ;;  %v513_v12 = vld [vmem:[%s688_s3 + $0x20] sm:$0xff]  }
   0x5   :  { %v507_v13 = vld [vmem:[%s687_s1 + $0x38] sm:$0xff]   ;;  %v514_v14 = vld [vmem:[%s688_s3 + $0x28] sm:$0xff]   ;;  %v508_v15 = vld [vmem:[%s689_s0] sm:$0xff]  }
   0x6   :  { %v515_v16 = vld [vmem:[%s688_s3 + $0x30] sm:$0xff]   ;;  %v516_v17 = vld [vmem:[%s688_s3 + $0x38] sm:$0xff]   ;;  %v517_v18 = vld [vmem:[%s690_s5] sm:$0xff]  }
   0x7   :  { %441 = vmatpush3.bf16.msra.mxu0 %v501_v2  ;;  %461 = vmatpush3.bf16.msra.mxu1 %v510_v6  ;;  %v518_v19 = vld [vmem:[%s690_s5 + $0x8] sm:$0xff]   ;;  %v519_v20 = vld [vmem:[%s690_s5 + $0x10] sm:$0xff]   ;;  %v520_v21 = vld [vmem:[%s690_s5 + $0x18] sm:$0xff]  }
   0x8   :  { %442 = vmatprep.subr.bf16.mxu0 %v525_v0  ;;  %462 = vmatprep.subr.bf16.mxu1 %v525_v0  ;;  %v521_v22 = vld [vmem:[%s690_s5 + $0x20] sm:$0xff]   ;;  %v522_v23 = vld [vmem:[%s690_s5 + $0x28] sm:$0xff]   ;;  %v523_v34 = vld [vmem:[%s690_s5 + $0x30] sm:$0xff]  }
   0x9   :  { %v383_v24 = vld [vmem:[%s691_s2] ss:$0 sm:$0xff]  ;;  %v524_v35 = vld [vmem:[%s690_s5 + $0x38] sm:$0xff]  }
   0xa   :  { %v393_v36 = vld [vmem:[%s692_s4] ss:$0 sm:$0xff] }
   0xb   :  { %443 = vmatpush3.bf16.msra.mxu0 %v502_v3  ;;  %463 = vmatpush3.bf16.msra.mxu1 %v511_v8  ;;  %v402_v46 = vld [vmem:[%s693_s6] ss:$0 sm:$0xff] }
   0xc   :  { %444 = vmatprep.subr.bf16.mxu0 %v525_v0  ;;  %464 = vmatprep.subr.bf16.mxu1 %v525_v0 }
   0xf   :  { %445 = vmatpush3.bf16.msra.mxu0 %v503_v5  ;;  %465 = vmatpush3.bf16.msra.mxu1 %v512_v10 }
  0x10   :  { %446 = vmatprep.subr.bf16.mxu0 %v525_v0  ;;  %466 = vmatprep.subr.bf16.mxu1 %v525_v0 }
  0x13   :  { %447 = vmatpush3.bf16.msra.mxu0 %v504_v7  ;;  %467 = vmatpush3.bf16.msra.mxu1 %v513_v12 }
  0x14   :  { %448 = vmatprep.subr.bf16.mxu0 %v525_v0  ;;  %468 = vmatprep.subr.bf16.mxu1 %v525_v0 }
  0x17   :  { %449 = vmatpush3.bf16.msra.mxu0 %v505_v9  ;;  %469 = vmatpush3.bf16.msra.mxu1 %v514_v14 }
  0x18   :  { %450 = vmatprep.subr.bf16.mxu0 %v525_v0  ;;  %470 = vmatprep.subr.bf16.mxu1 %v525_v0 }
  0x1b   :  { %451 = vmatpush3.bf16.msra.mxu0 %v506_v11  ;;  %471 = vmatpush3.bf16.msra.mxu1 %v515_v16 }
  0x1c   :  { %452 = vmatprep.subr.bf16.mxu0 %v525_v0  ;;  %472 = vmatprep.subr.bf16.mxu1 %v525_v0 }
  0x1f   :  { %453 = vmatpush3.bf16.msra.mxu0 %v507_v13  ;;  %473 = vmatpush3.bf16.msra.mxu1 %v516_v17 }
  0x20   :  { %478 = vmatprep.subr.bf16.mxu0 %v525_v0 }
  0x22   :  { %455 = vmatmul.mubr.bf16.vlgmr.msra.gmra.mrb[0].mxu0 %v508_v15 }
  0x23   :  { %494 = vmatprep.mubr.msk.bf16.mxu0 %vm526_vm0, %v525_v0  ;;  %479 = vmatpush3.bf16.msra.mxu0 %v517_v18 }
  0x24   :  { %480 = vmatprep.subr.bf16.mxu0 %v525_v0 }
  0x27   :  { %481 = vmatpush3.bf16.msra.mxu0 %v518_v19 }
  0x28   :  { %482 = vmatprep.subr.bf16.mxu0 %v525_v0 }
  0x2b   :  { %483 = vmatpush3.bf16.msra.mxu0 %v519_v20 }
  0x2c   :  { %484 = vmatprep.subr.bf16.mxu0 %v525_v0 }
  0x2f   :  { %485 = vmatpush3.bf16.msra.mxu0 %v520_v21 }
  0x30   :  { %486 = vmatprep.subr.bf16.mxu0 %v525_v0 }
  0x33   :  { %487 = vmatpush3.bf16.msra.mxu0 %v521_v22 }
  0x34   :  { %488 = vmatprep.subr.bf16.mxu0 %v525_v0 }
  0x37   :  { %489 = vmatpush3.bf16.msra.mxu0 %v522_v23 }
  0x38   :  { %490 = vmatprep.subr.bf16.mxu0 %v525_v0 }
  0x3b   :  { %491 = vmatpush3.bf16.msra.mxu0 %v523_v34 }
  0x3c   :  { %492 = vmatprep.subr.bf16.mxu0 %v525_v0 }
  0x3f   :  { %493 = vmatpush3.bf16.msra.mxu0 %v524_v35 }
  0xf5   :  { %v140_v25 = vpop.f32.mrb[0].mxu0 }
  0xf6   :  { %v141_v26 = vadd.f32 %v383_v24, %v140_v25  ;;  %v456_v27 = vpop.f32.mrb[1].mxu0 }
  0xf7   :  { %v143_v28 = vpop.f32.mrb[2].mxu0 }
  0xf8   :  { %v144_v29 = vadd.f32 %v383_v24, %v143_v28  ;;  %v457_v30 = vpop.f32.mrb[3].mxu0  ;;  %v147_v31 = vmax.f32 %v141_v26, 0.0 }
  0xfa   :  { %v148_v32 = vmax.f32 %v144_v29, 0.0 }
  0xfc   :  { %v149_v33 = vpack.c.bf16 %v148_v32, %v147_v31 }
  0xfe   :  { %475 = vmatmul.mubr.bf16.vlgmr.msra.gmra.mrb[0].mxu1 %v149_v33 }
 0x1d1   :  { %v255_v37 = vpop.f32.mrb[0].mxu1 }
 0x1d2   :  { %v256_v38 = vadd.f32 %v393_v36, %v255_v37  ;;  %v476_v39 = vpop.f32.mrb[1].mxu1 }
 0x1d3   :  { %v258_v40 = vpop.f32.mrb[2].mxu1 }
 0x1d4   :  { %v259_v41 = vadd.f32 %v393_v36, %v258_v40  ;;  %v477_v42 = vpop.f32.mrb[3].mxu1  ;;  %v262_v43 = vmax.f32 %v256_v38, 0.0 }
 0x1d6   :  { %v263_v44 = vmax.f32 %v259_v41, 0.0 }
 0x1d8   :  { %v264_v45 = vpack.c.bf16 %v263_v44, %v262_v43 }
 0x1da   :  { %495 = vmatmul.mubr.bf16.vlgmr.msra.gmra.mrb[4].mxu0 %v264_v45 }
 0x2ad   :  { %v370_v47 = vpop.f32.mrb[4].mxu0 }
 0x2ae   :  { %v371_v48 = vadd.f32 %v402_v46, %v370_v47  ;;  %v496_v49 = vpop.f32.mrb[5].mxu0 }
 0x2af   :  { %v373_v50 = vpop.f32.mrb[6].mxu0 }
 0x2b0   :  { %377 = vst [vmem:[%s694_s7] sm:$0xff] %v371_v48  ;;  %v374_v51 = vadd.f32 %v402_v46, %v373_v50  ;;  %v497_v52 = vpop.f32.mrb[7].mxu0 }
 0x2b2   :  { %378 = vst [vmem:[%s694_s7 + $0x8] sm:$0xff] %v374_v51 }

</bundles_post_ra>
